<compile_context>
chip_gen: v7x
topology: tpu7x:2x2x1
jax: 0.10.0
libtpu: 0.0.40
codegen_flags: <defaults>
</compile_context>

<pallas_src>
import jax
import jax.numpy as jnp
from jax.experimental import pallas as pl
from jax.experimental.pallas import tpu as pltpu

_LANES = 128  # lane-dense output width (one full vreg lane row)


def _net_kernel(params_ref, o_ref):
    # params_ref: (1, 2) f32 in SMEM -> [W, meta]
    # o_ref:      (1, _LANES) f32 in VMEM
    w = params_ref[0, 0]
    m = params_ref[0, 1]
    val = w * w + m * m                      # W**2 + meta**2
    o_ref[...] = jnp.full(o_ref.shape, val, dtype=o_ref.dtype)


def net_forward(x, W, meta):
    """Pallas equivalent of Net.forward.

    x:    [B, C, H, W] array (only the batch dim is used, as in the module)
    W:    shape (1,) parameter
    meta: shape (1,) buffer
    returns: shape (B,) f32, each element = W**2 + meta**2
    """
    B = x.shape[0]
    # Single packed scalar input -> one SMEM DMA.
    params = jnp.concatenate(
        [W.reshape(-1), meta.reshape(-1)]
    ).reshape(1, 2).astype(jnp.float32)

    out = pl.pallas_call(
        _net_kernel,
        out_shape=jax.ShapeDtypeStruct((1, _LANES), jnp.float32),
        in_specs=[pl.BlockSpec(memory_space=pltpu.SMEM)],
        out_specs=pl.BlockSpec(memory_space=pltpu.MemorySpace.VMEM),
        cost_estimate=pl.CostEstimate(
            flops=4, transcendentals=0, bytes_accessed=8 + 4 * _LANES
        ),
    )(params)
    return out[0, :B]


if __name__ == "__main__":
    key = jax.random.PRNGKey(0)
    # Deterministic parameters matching the module's __init__:
    #   self.W = nn.Parameter(torch.tensor([1.0]));  meta = torch.tensor([-1.0])
    W = jnp.array([1.0], dtype=jnp.float32)
    meta = jnp.array([-1.0], dtype=jnp.float32)

    # Small NCHW input consistent with a conv-style module signature.
    x = jax.random.normal(key, (2, 4, 16, 16), dtype=jnp.float32)

    out = net_forward(x, W, meta)
    out = jax.block_until_ready(out)

    # Reference: W**2 + meta**2 expanded over the batch.
    ref = jnp.broadcast_to(W**2 + meta**2, (x.shape[0],))
    assert out.shape == (x.shape[0],), out.shape
    assert jnp.allclose(out, ref), (out, ref)
    print("KERNEL_OK")
</pallas_src>

<mosaic_0001>
module attributes {stable_mosaic.version = 11 : i64} {
  func.func @_net_kernel(%arg0: memref<1x2xf32, #tpu.memory_space<smem>>, %arg1: memref<1x128xf32, #tpu.memory_space<vmem>>) attributes {dimension_semantics = [], scalar_prefetch = 0 : i64, scratch_operands = 0 : i64, tpu.core_type = #tpu.core_type<tc>} {
    %c0 = arith.constant 0 : index
    %c0_0 = arith.constant 0 : index
    %0 = memref.load %arg0[%c0, %c0_0] : memref<1x2xf32, #tpu.memory_space<smem>>
    %c0_1 = arith.constant 0 : index
    %c1 = arith.constant 1 : index
    %1 = memref.load %arg0[%c0_1, %c1] : memref<1x2xf32, #tpu.memory_space<smem>>
    %2 = arith.mulf %0, %0 : f32
    %3 = arith.mulf %1, %1 : f32
    %4 = arith.addf %2, %3 : f32
    %5 = vector.broadcast %4 : f32 to vector<1x128xf32>
    %c0_2 = arith.constant 0 : index
    %c0_3 = arith.constant 0 : index
    %6 = vector.load %arg1[%c0_2, %c0_3] : memref<1x128xf32, #tpu.memory_space<vmem>>, vector<1x128xf32>
    tpu.vector_store %arg1[%c0_2, %c0_3], %5 {strides = array<i32>} : memref<1x128xf32, #tpu.memory_space<vmem>>, vector<1x128xf32>,
    return
  }
}

</mosaic_0001>

<bundles_post_ra>
// kernel: tpu_custom_call.1
= control target key start
LH: loop header
LB: loop body
LE: loop exit
PB: predicated region body
PF: predicated region fallthrough
CT: control target
= control target key end

     0   :  { %6 = vsyncpa [#allocation4], 0  ;;  %s117_s0 = inlined_call_operand.hbm [shape: f32[1,2], index: 0, kind: input, shape index: {}]   ;;  %s118_s1 = inlined_call_operand.hbm [shape: f32[1,128], index: 1, kind: output, shape index: {}]  }
   0x1   :  { %7 = vsyncpa [#allocation3], 0  ;;  %s45_s8 = scalar_lea.hbm %s117_s0, 16 }
   0x2   :  { %p46_p0 = scmp.ne.s32.totalorder %s117_s0, %s45_s8  ;;  %p49_p1 = scmp.lt.u32.totalorder %s45_s8, %s117_s0 }
   0x4   :  { %p51_p2 = pnand %p49_p1, %p46_p0 }
   0x6   :  { %54 = shalt.err (!%p51_p2)
}
   0x7   :  { %s81_s13 = smov [#allocation2]  }
   0x8   :  { %15 = dma.hbm_to_smem %s117_s0, 16, %s81_s13, [#allocation4]  }
   0x9   :  { %77 = dma.done.wait [#allocation4], 16  }
   0xa   :  { %78 = vsyncadd [#allocation4], 4294967280 }
   0xb   :  { %19 = sfence }
   0xc   :  { %s20_s16 = sld [smem:[#allocation2]]  ;;  %s42_s17 = sld [smem:[#allocation2 + $0x1]] }
   0xd   :  { %s82_s20 = smov [#allocation5]  }
   0xe   :  { %s33_s21 = sshll.u32 %s82_s20, 4  ;;  %s34_s21 = int_to_ptr.vmem [resolvable:$true] %s33_s21 }
   0xf   :  { %s55_s23 = scalar_lea.vmem %s34_s21, 16  ;;  %s59_s24 = scalar_lea.vmem %s34_s21, 32 }
  0x10   :  { %p56_p3 = scmp.ne.s32.totalorder %s34_s21, %s55_s23  ;;  %p60_p4 = scmp.lt.s32.totalorder %s34_s21, %s34_s21 }
  0x11   :  { %p61_p5 = scmp.lt.s32.totalorder %s59_s24, %s55_s23 }
  0x12   :  { %s22_s18 = smul.f32 %s20_s16, %s20_s16 }
  0x13   :  { %s23_s19 = smul.f32 %s42_s17, %s42_s17  ;;  %p62_p6 = por %p61_p5, %p60_p4 }
  0x15   :  { %s24_s22 = sadd.f32 %s23_s19, %s22_s18  ;;  %p63_p7 = pnand %p62_p6, %p56_p3 }
  0x17   :  { %v25_v0 = vstv %s24_s22 }
  0x18   :  { %26 = vst [vmem:[#allocation5] sm:$0x1] %v25_v0 }
  0x19   :  { %66 = shalt.err (!%p63_p7)
}
  0x1a   :  { %s67_s26 = scalar_lea.hbm %s118_s1, 16 }
  0x1b   :  { %p68_p8 = scmp.ne.s32.totalorder %s118_s1, %s67_s26  ;;  %p71_p9 = scmp.lt.u32.totalorder %s67_s26, %s118_s1 }
  0x1d   :  { %p73_p10 = pnand %p71_p9, %p68_p8 }
  0x1f   :  { %76 = shalt.err (!%p73_p10)
}
  0x20   :  { %36 = dma.vmem_to_hbm [thread:$0]  %s34_s21, 16, %s118_s1, [#allocation3]  }
  0x21   :  { %79 = dma.done.wait [#allocation3], 16  }
  0x22   :  { %80 = vsyncadd [#allocation3], 4294967280 }
  0x23   :  { %40 = vsyncpa [#allocation3], 1 }
  0x24   :  { %41 = vsyncpa [#allocation4], 1 }

</bundles_post_ra>
